<compile_context>
chip_gen: v5e
topology: v5e:2x2
jax: 0.10.0
libtpu: 0.0.40
codegen_flags: <defaults>
</compile_context>

<pallas_src>
import functools

import jax
import jax.numpy as jnp
import numpy as np
from jax.experimental import pallas as pl
from jax.experimental.pallas import tpu as pltpu

LANE = 128


def _round_up(x, m):
    return (x + m - 1) // m * m


def _tpu_vmem_capacity_bytes():
    """Per-core VMEM capacity; conservative 64 MiB (v7x) fallback."""
    try:
        info = pltpu.get_tpu_info()
        cap = int(getattr(info, "vmem_capacity_bytes", 0) or 0)
        if cap >= (16 << 20):
            return cap
    except Exception:
        pass
    return 64 * 1024 * 1024


def _choose_tile_l(L, P, sublane, per_row_bytes, fixed_bytes, budget_bytes):
    """Largest L tile (sublane multiple, >= P) fitting the VMEM budget."""
    min_tl = _round_up(max(P, sublane), sublane)
    avail = max(budget_bytes - fixed_bytes, 0)
    max_tl = max(avail // max(per_row_bytes, 1), min_tl)
    tl = min(int(max_tl), _round_up(L, sublane), 2048)
    if tl >= 256:
        tl = tl // 256 * 256          # fill the 256-row MXU pass on v6e/v7x
    else:
        tl = max(tl // sublane * sublane, sublane)
    return max(tl, min_tl)


# -----------------------------------------------------------------------------
# Fused kernel: causal conv1 -> relu -> causal conv2 -> relu -> residual -> relu
# -----------------------------------------------------------------------------
def _temporal_block_kernel(*refs, K, dilation, TL, P, PA, has_downsample, cd):
    if has_downsample:
        (x_ref, w1_ref, b1_ref, w2_ref, b2_ref, wd_ref, bd_ref,
         o_ref, xh_buf, hh_buf) = refs
    else:
        (x_ref, w1_ref, b1_ref, w2_ref, b2_ref,
         o_ref, xh_buf, hh_buf) = refs
        wd_ref = bd_ref = None

    cin_p = xh_buf.shape[-1]
    cout_p = hh_buf.shape[-1]
    base = PA - P                         # first live halo row inside the scratch
    j = pl.program_id(1)                  # sequential ("arbitrary") L-tile index

    x_tile = x_ref[0]                     # (TL, cin_p), compute dtype

    if P > 0:
        # Zero the causal left zero-pad at the start of every sequence.
        @pl.when(j == 0)
        def _zero_halo():
            xh_buf[0:PA, :] = jnp.zeros((PA, cin_p), cd)
            hh_buf[0:PA, :] = jnp.zeros((PA, cout_p), cd)

        # Stage the x tile after the halo (sublane-aligned store) so the
        # dilated tap windows can be read contiguously across the tile edge.
        xh_buf[PA:PA + TL, :] = x_tile

    # ---- conv1: K accumulated MXU dots over dilated taps ---------------------
    h1 = None
    for k in range(K):
        win = x_tile if k == K - 1 else xh_buf[base + k * dilation:
                                               base + k * dilation + TL, :]
        part = jnp.dot(win, w1_ref[k], preferred_element_type=jnp.float32)
        h1 = part if h1 is None else h1 + part
    h1 = jnp.maximum(h1 + b1_ref[...], 0.0)       # relu1 (dropout1 = identity)
    h1c = h1.astype(cd)

    if P > 0:
        hh_buf[PA:PA + TL, :] = h1c               # h1 never leaves VMEM

    # ---- conv2: K accumulated MXU dots ---------------------------------------
    out = None
    for k in range(K):
        win = h1c if k == K - 1 else hh_buf[base + k * dilation:
                                            base + k * dilation + TL, :]
        part = jnp.dot(win, w2_ref[k], preferred_element_type=jnp.float32)
        out = part if out is None else out + part
    out = jnp.maximum(out + b2_ref[...], 0.0)     # relu2 (dropout2 = identity)

    # ---- residual (1x1 conv or identity) + final ReLU -------------------------
    if has_downsample:
        res = jnp.dot(x_tile, wd_ref[...],
                      preferred_element_type=jnp.float32) + bd_ref[...]
    else:
        res = x_tile.astype(jnp.float32)
    o_ref[0] = jnp.maximum(out + res, 0.0).astype(o_ref.dtype)

    # ---- carry the last P rows of x / h1 into the next tile's halo -----------
    if P > 0:
        @pl.when(j < pl.num_programs(1) - 1)
        def _carry_halo():
            xh_buf[base:PA, :] = xh_buf[PA + TL - P:PA + TL, :]
            hh_buf[base:PA, :] = hh_buf[PA + TL - P:PA + TL, :]


# -----------------------------------------------------------------------------
# Channel-padded NLC entry point -- stacked TCN blocks should chain this one.
# -----------------------------------------------------------------------------
def temporal_block_forward_nlc_padded(x_p, w1, b1, w2, b2, wd=None, bd=None, *,
                                      kernel_size, dilation,
                                      compute_dtype=jnp.float32, tile_l=None,
                                      out_dtype=None):
    """x_p: (N, L, cin_p) with cin_p % 128 == 0 and zero padding channels.
    Returns (N, L, cout_p) with cout_p = round_up(Cout, 128); padding output
    channels are exactly zero, so blocks can be chained without per-block
    pad/crop (crop channels once at the network output)."""
    N, L, cin_p = x_p.shape
    assert cin_p % LANE == 0
    Cout, Cin, K = w1.shape
    assert K == kernel_size and Cin <= cin_p
    P = (K - 1) * dilation
    has_downsample = wd is not None
    if not has_downsample:
        assert Cin == Cout, "identity residual requires Cin == Cout"

    cd = jnp.dtype(compute_dtype)
    it = cd.itemsize
    sublane = 16 if it == 2 else 8          # bf16 packs pairs of sublanes
    cout_p = _round_up(Cout, LANE)
    if out_dtype is None:
        out_dtype = x_p.dtype
    out_it = jnp.dtype(out_dtype).itemsize
    PA = _round_up(P, sublane) if P > 0 else 0   # sublane-aligned halo region

    # ---- lane-dense per-tap weights / biases (done once, tiny) ---------------
    w1_p = jnp.pad(jnp.transpose(w1, (2, 1, 0)),                 # (K, Cin, Cout)
                   ((0, 0), (0, cin_p - Cin), (0, cout_p - Cout))).astype(cd)
    w2_p = jnp.pad(jnp.transpose(w2, (2, 1, 0)),                 # (K, Cout, Cout)
                   ((0, 0), (0, cout_p - Cout), (0, cout_p - Cout))).astype(cd)
    b1_p = jnp.pad(b1, (0, cout_p - Cout)).reshape(1, cout_p).astype(jnp.float32)
    b2_p = jnp.pad(b2, (0, cout_p - Cout)).reshape(1, cout_p).astype(jnp.float32)

    # ---- generation-aware L tiling --------------------------------------------
    vmem_cap = _tpu_vmem_capacity_bytes()          # 128 MiB v5e/v6e, 64 MiB v7x
    tile_budget = int(vmem_cap * 0.40)
    per_row = 2 * cin_p * it + 2 * cout_p * out_it   # double-buffered in/out blocks
    per_row += (cin_p + cout_p) * it                 # halo+tile staging scratch
    per_row += (K + 2) * (cin_p + cout_p) * 4        # live f32 / tap-window values
    w_bytes = (K * cin_p * cout_p + K * cout_p * cout_p) * it + 2 * cout_p * 4
    if has_downsample:
        w_bytes += cin_p * cout_p * it + cout_p * 4
    fixed = 2 * w_bytes + PA * (cin_p + cout_p) * it + (2 << 20)

    if tile_l is None:
        TL = _choose_tile_l(L, P, sublane, per_row, fixed, tile_budget)
    else:
        TL = int(tile_l)
        assert TL % sublane == 0 and TL >= max(P, sublane), (
            "tile_l must be a sublane multiple and >= the causal pad")
    num_tiles = pl.cdiv(L, TL)
    L_pad = num_tiles * TL

    x_in = x_p.astype(cd)
    if L_pad != L:                                  # pad L once; crop at the end
        x_in = jnp.pad(x_in, ((0, 0), (0, L_pad - L), (0, 0)))

    est = TL * per_row + fixed
    upper = min(int(vmem_cap * 0.85), vmem_cap - (8 << 20))
    vmem_limit = int(min(max(2 * est, 32 << 20), upper))

    args = [x_in, w1_p, b1_p, w2_p, b2_p]
    in_specs = [
        pl.BlockSpec((1, TL, cin_p), lambda n, j: (n, j, 0)),
        pl.BlockSpec((K, cin_p, cout_p), lambda n, j: (0, 0, 0)),  # resident weights
        pl.BlockSpec((1, cout_p), lambda n, j: (0, 0)),
        pl.BlockSpec((K, cout_p, cout_p), lambda n, j: (0, 0, 0)),
        pl.BlockSpec((1, cout_p), lambda n, j: (0, 0)),
    ]
    if has_downsample:
        wd_p = jnp.pad(jnp.transpose(wd, (1, 0)),
                       ((0, cin_p - Cin), (0, cout_p - Cout))).astype(cd)
        bd_p = jnp.pad(bd, (0, cout_p - Cout)).reshape(1, cout_p).astype(jnp.float32)
        args += [wd_p, bd_p]
        in_specs += [pl.BlockSpec((cin_p, cout_p), lambda n, j: (0, 0)),
                     pl.BlockSpec((1, cout_p), lambda n, j: (0, 0))]

    flops = 2 * N * L_pad * K * (cin_p + cout_p) * cout_p
    if has_downsample:
        flops += 2 * N * L_pad * cin_p * cout_p
    bytes_accessed = (N * L_pad * cin_p * it + N * L_pad * cout_p * out_it
                      + (K * cin_p * cout_p + K * cout_p * cout_p) * it)

    kernel = functools.partial(
        _temporal_block_kernel, K=K, dilation=dilation, TL=TL, P=P, PA=PA,
        has_downsample=has_downsample, cd=cd)

    out = pl.pallas_call(
        kernel,
        out_shape=jax.ShapeDtypeStruct((N, L_pad, cout_p), out_dtype),
        grid=(N, num_tiles),
        in_specs=in_specs,
        out_specs=pl.BlockSpec((1, TL, cout_p), lambda n, j: (n, j, 0)),
        scratch_shapes=[
            pltpu.VMEM((PA + TL, cin_p), cd),   # x tile + causal halo
            pltpu.VMEM((PA + TL, cout_p), cd),  # h1 tile + causal halo
        ],
        compiler_params=pltpu.CompilerParams(
            dimension_semantics=("parallel", "arbitrary"),
            vmem_limit_bytes=vmem_limit),
        cost_estimate=pl.CostEstimate(flops=int(flops), transcendentals=0,
                                      bytes_accessed=int(bytes_accessed)),
    )(*args)

    if L_pad != L:
        out = out[:, :L, :]
    return out


# -----------------------------------------------------------------------------
# Channels-last (N, L, C) entry point (pads/crops channels for a single block).
# -----------------------------------------------------------------------------
def temporal_block_forward_nlc(x, w1, b1, w2, b2, wd=None, bd=None, *,
                               kernel_size, dilation,
                               compute_dtype=jnp.float32, tile_l=None):
    N, L, Cin = x.shape
    Cout = w1.shape[0]
    cin_p = _round_up(Cin, LANE)
    x_p = x if cin_p == Cin else jnp.pad(x, ((0, 0), (0, 0), (0, cin_p - Cin)))
    out = temporal_block_forward_nlc_padded(
        x_p, w1, b1, w2, b2, wd, bd, kernel_size=kernel_size, dilation=dilation,
        compute_dtype=compute_dtype, tile_l=tile_l, out_dtype=x.dtype)
    return out[:, :, :Cout]


# -----------------------------------------------------------------------------
# PyTorch-layout (N, C, L) wrapper (parity with the nn.Module interface).
# -----------------------------------------------------------------------------
def temporal_block_forward(x_ncl, w1, b1, w2, b2, wd=None, bd=None, *,
                           kernel_size, stride, dilation,
                           compute_dtype=jnp.float32, tile_l=None):
    assert stride == 1, "TemporalBlock crop semantics require stride=1"
    x_nlc = jnp.transpose(x_ncl, (0, 2, 1))
    out_nlc = temporal_block_forward_nlc(
        x_nlc, w1, b1, w2, b2, wd, bd, kernel_size=kernel_size,
        dilation=dilation, compute_dtype=compute_dtype, tile_l=tile_l)
    return jnp.transpose(out_nlc, (0, 2, 1))


# -----------------------------------------------------------------------------
# Pure-numpy float64 reference mirroring the PyTorch module (causal-equivalent).
# -----------------------------------------------------------------------------
def reference_forward(x, w1, b1, w2, b2, wd=None, bd=None, *, kernel_size, dilation):
    x = np.asarray(x, np.float64)
    w1 = np.asarray(w1, np.float64); b1 = np.asarray(b1, np.float64)
    w2 = np.asarray(w2, np.float64); b2 = np.asarray(b2, np.float64)
    P = (kernel_size - 1) * dilation

    def causal_conv(inp, w, b):                     # inp (N,C,L), w (Co,Ci,K)
        N, Ci, L = inp.shape
        xp = np.concatenate([np.zeros((N, Ci, P)), inp], axis=2)
        out = np.zeros((N, w.shape[0], L))
        for k in range(kernel_size):
            out += np.einsum('oc,ncl->nol', w[:, :, k],
                             xp[:, :, k * dilation:k * dilation + L])
        return out + b[None, :, None]

    h1 = np.maximum(causal_conv(x, w1, b1), 0.0)
    h2 = np.maximum(causal_conv(h1, w2, b2), 0.0)
    if wd is None:
        res = x
    else:
        res = (np.einsum('oc,ncl->nol', np.asarray(wd, np.float64), x)
               + np.asarray(bd, np.float64)[None, :, None])
    return np.maximum(h2 + res, 0.0)


if __name__ == "__main__":
    kernel_size, stride, dilation = 3, 1, 2

    # ---- config A: Cin != Cout (1x1 downsample residual), single L tile ------
    N, Cin, Cout, L = 2, 4, 8, 16
    key = jax.random.PRNGKey(0)
    k1, k2, k3, k4, k5, k6, k7 = jax.random.split(key, 7)
    x = jax.random.normal(k1, (N, Cin, L), jnp.float32)
    w1 = jax.random.normal(k2, (Cout, Cin, kernel_size), jnp.float32) * 0.2
    b1 = jax.random.normal(k3, (Cout,), jnp.float32) * 0.1
    w2 = jax.random.normal(k4, (Cout, Cout, kernel_size), jnp.float32) * 0.2
    b2 = jax.random.normal(k5, (Cout,), jnp.float32) * 0.1
    wd = jax.random.normal(k6, (Cout, Cin), jnp.float32) * 0.2
    bd = jax.random.normal(k7, (Cout,), jnp.float32) * 0.1

    ref = reference_forward(np.asarray(x), np.asarray(w1), np.asarray(b1),
                            np.asarray(w2), np.asarray(b2), np.asarray(wd),
                            np.asarray(bd), kernel_size=kernel_size,
                            dilation=dilation)

    out_f32 = jax.block_until_ready(temporal_block_forward(
        x, w1, b1, w2, b2, wd, bd, kernel_size=kernel_size, stride=stride,
        dilation=dilation, compute_dtype=jnp.float32))
    np.testing.assert_allclose(np.asarray(out_f32), ref, rtol=2e-3, atol=2e-3)

    out_bf16 = jax.block_until_ready(temporal_block_forward(
        x, w1, b1, w2, b2, wd, bd, kernel_size=kernel_size, stride=stride,
        dilation=dilation, compute_dtype=jnp.bfloat16))
    np.testing.assert_allclose(np.asarray(out_bf16), ref, rtol=5e-2, atol=8e-2)

    # ---- config B: Cin == Cout -> identity residual (1x1 matmul skipped) ------
    kb = jax.random.split(jax.random.PRNGKey(1), 5)
    xb = jax.random.normal(kb[0], (N, Cout, L), jnp.float32)
    w1b = jax.random.normal(kb[1], (Cout, Cout, kernel_size), jnp.float32) * 0.2
    b1b = jax.random.normal(kb[2], (Cout,), jnp.float32) * 0.1
    w2b = jax.random.normal(kb[3], (Cout, Cout, kernel_size), jnp.float32) * 0.2
    b2b = jax.random.normal(kb[4], (Cout,), jnp.float32) * 0.1
    refb = reference_forward(np.asarray(xb), np.asarray(w1b), np.asarray(b1b),
                             np.asarray(w2b), np.asarray(b2b), None, None,
                             kernel_size=kernel_size, dilation=dilation)
    outb = jax.block_until_ready(temporal_block_forward(
        xb, w1b, b1b, w2b, b2b, None, None, kernel_size=kernel_size,
        stride=stride, dilation=dilation))
    np.testing.assert_allclose(np.asarray(outb), refb, rtol=2e-3, atol=2e-3)

    # ---- config C: multi-tile L (halo carry) + L not divisible by tile_l ------
    Lc, dil_c, tile_c = 60, 3, 16
    kc = jax.random.split(jax.random.PRNGKey(2), 7)
    xc = jax.random.normal(kc[0], (N, Cin, Lc), jnp.float32)
    w1c = jax.random.normal(kc[1], (Cout, Cin, kernel_size), jnp.float32) * 0.2
    b1c = jax.random.normal(kc[2], (Cout,), jnp.float32) * 0.1
    w2c = jax.random.normal(kc[3], (Cout, Cout, kernel_size), jnp.float32) * 0.2
    b2c = jax.random.normal(kc[4], (Cout,), jnp.float32) * 0.1
    wdc = jax.random.normal(kc[5], (Cout, Cin), jnp.float32) * 0.2
    bdc = jax.random.normal(kc[6], (Cout,), jnp.float32) * 0.1
    refc = reference_forward(np.asarray(xc), np.asarray(w1c), np.asarray(b1c),
                             np.asarray(w2c), np.asarray(b2c), np.asarray(wdc),
                             np.asarray(bdc), kernel_size=kernel_size,
                             dilation=dil_c)
    outc = jax.block_until_ready(temporal_block_forward(
        xc, w1c, b1c, w2c, b2c, wdc, bdc, kernel_size=kernel_size,
        stride=stride, dilation=dil_c, tile_l=tile_c))
    np.testing.assert_allclose(np.asarray(outc), refc, rtol=2e-3, atol=2e-3)

    print("KERNEL_OK")
</pallas_src>

<mosaic_0001>
module attributes {stable_mosaic.version = 11 : i64} {
  func.func @_temporal_block_kernel(%arg0: i32, %arg1: i32, %arg2: memref<1x16x128xf32, #tpu.memory_space<vmem>>, %arg3: memref<3x128x128xf32, #tpu.memory_space<vmem>>, %arg4: memref<1x128xf32, #tpu.memory_space<vmem>>, %arg5: memref<3x128x128xf32, #tpu.memory_space<vmem>>, %arg6: memref<1x128xf32, #tpu.memory_space<vmem>>, %arg7: memref<128x128xf32, #tpu.memory_space<vmem>>, %arg8: memref<1x128xf32, #tpu.memory_space<vmem>>, %arg9: memref<1x16x128xf32, #tpu.memory_space<vmem>>, %arg10: memref<24x128xf32, #tpu.memory_space<vmem>>, %arg11: memref<24x128xf32, #tpu.memory_space<vmem>>) attributes {dimension_semantics = [#tpu.dimension_semantics<parallel>, #tpu.dimension_semantics<arbitrary>], iteration_bounds = array<i64: 2, 1>, scalar_prefetch = 0 : i64, scratch_operands = 2 : i64, tpu.core_type = #tpu.core_type<tc>, window_params = [{transform_indices = @transform_0, window_bounds = array<i64: 1, 16, 128>}, {pipeline_mode = #tpu.pipeline_mode<synchronous>, transform_indices = @transform_1, window_bounds = array<i64: 3, 128, 128>}, {pipeline_mode = #tpu.pipeline_mode<synchronous>, transform_indices = @transform_2, window_bounds = array<i64: 1, 128>}, {pipeline_mode = #tpu.pipeline_mode<synchronous>, transform_indices = @transform_3, window_bounds = array<i64: 3, 128, 128>}, {pipeline_mode = #tpu.pipeline_mode<synchronous>, transform_indices = @transform_4, window_bounds = array<i64: 1, 128>}, {pipeline_mode = #tpu.pipeline_mode<synchronous>, transform_indices = @transform_5, window_bounds = array<i64: 128, 128>}, {pipeline_mode = #tpu.pipeline_mode<synchronous>, transform_indices = @transform_6, window_bounds = array<i64: 1, 128>}, {transform_indices = @transform_7, window_bounds = array<i64: 1, 16, 128>}]} {
    %c0 = arith.constant 0 : index
    %c0_0 = arith.constant 0 : index
    %c0_1 = arith.constant 0 : index
    %0 = vector.load %arg2[%c0, %c0_0, %c0_1] : memref<1x16x128xf32, #tpu.memory_space<vmem>>, vector<1x16x128xf32>
    %1 = vector.shape_cast %0 : vector<1x16x128xf32> to vector<16x128xf32>
    %c0_i32 = arith.constant 0 : i32
    %2 = arith.cmpi eq, %arg1, %c0_i32 : i32
    %3 = arith.extui %2 : i1 to i32
    %c0_i32_2 = arith.constant 0 : i32
    %4 = arith.cmpi ne, %3, %c0_i32_2 : i32
    scf.if %4 {
      %cst_50 = arith.constant 0.000000e+00 : f32
      %57 = vector.broadcast %cst_50 : f32 to vector<8x128xf32>
      %c0_51 = arith.constant 0 : index
      %c0_52 = arith.constant 0 : index
      %58 = vector.load %arg10[%c0_51, %c0_52] : memref<24x128xf32, #tpu.memory_space<vmem>>, vector<8x128xf32>
      tpu.vector_store %arg10[%c0_51, %c0_52], %57 {strides = array<i32>} : memref<24x128xf32, #tpu.memory_space<vmem>>, vector<8x128xf32>,
      %cst_53 = arith.constant 0.000000e+00 : f32
      %59 = vector.broadcast %cst_53 : f32 to vector<8x128xf32>
      %c0_54 = arith.constant 0 : index
      %c0_55 = arith.constant 0 : index
      %60 = vector.load %arg11[%c0_54, %c0_55] : memref<24x128xf32, #tpu.memory_space<vmem>>, vector<8x128xf32>
      tpu.vector_store %arg11[%c0_54, %c0_55], %59 {strides = array<i32>} : memref<24x128xf32, #tpu.memory_space<vmem>>, vector<8x128xf32>,
    } else {
    }
    %c8 = arith.constant 8 : index
    %c0_3 = arith.constant 0 : index
    %5 = vector.load %arg10[%c8, %c0_3] : memref<24x128xf32, #tpu.memory_space<vmem>>, vector<16x128xf32>
    tpu.vector_store %arg10[%c8, %c0_3], %1 {strides = array<i32>} : memref<24x128xf32, #tpu.memory_space<vmem>>, vector<16x128xf32>,
    %c4 = arith.constant 4 : index
    %c0_4 = arith.constant 0 : index
    %6 = vector.load %arg10[%c4, %c0_4] : memref<24x128xf32, #tpu.memory_space<vmem>>, vector<16x128xf32>
    %c0_5 = arith.constant 0 : index
    %c0_6 = arith.constant 0 : index
    %c0_7 = arith.constant 0 : index
    %7 = vector.load %arg3[%c0_5, %c0_6, %c0_7] : memref<3x128x128xf32, #tpu.memory_space<vmem>>, vector<1x128x128xf32>
    %8 = vector.shape_cast %7 : vector<1x128x128xf32> to vector<128x128xf32>
    %cst = arith.constant dense<0.000000e+00> : vector<16x128xf32>
    %9 = tpu.matmul %6, %8, %cst {dimension_numbers = #tpu.dot_dimension_numbers<[1], [0], [0], [1], [0, 0, 1, 1], [], []>} : vector<16x128xf32>, vector<128x128xf32>, vector<16x128xf32> -> vector<16x128xf32>
    %c6 = arith.constant 6 : index
    %c0_8 = arith.constant 0 : index
    %10 = vector.load %arg10[%c6, %c0_8] : memref<24x128xf32, #tpu.memory_space<vmem>>, vector<16x128xf32>
    %c1 = arith.constant 1 : index
    %c0_9 = arith.constant 0 : index
    %c0_10 = arith.constant 0 : index
    %11 = vector.load %arg3[%c1, %c0_9, %c0_10] : memref<3x128x128xf32, #tpu.memory_space<vmem>>, vector<1x128x128xf32>
    %12 = vector.shape_cast %11 : vector<1x128x128xf32> to vector<128x128xf32>
    %cst_11 = arith.constant dense<0.000000e+00> : vector<16x128xf32>
    %13 = tpu.matmul %10, %12, %cst_11 {dimension_numbers = #tpu.dot_dimension_numbers<[1], [0], [0], [1], [0, 0, 1, 1], [], []>} : vector<16x128xf32>, vector<128x128xf32>, vector<16x128xf32> -> vector<16x128xf32>
    %14 = arith.addf %9, %13 : vector<16x128xf32>
    %c2 = arith.constant 2 : index
    %c0_12 = arith.constant 0 : index
    %c0_13 = arith.constant 0 : index
    %15 = vector.load %arg3[%c2, %c0_12, %c0_13] : memref<3x128x128xf32, #tpu.memory_space<vmem>>, vector<1x128x128xf32>
    %16 = vector.shape_cast %15 : vector<1x128x128xf32> to vector<128x128xf32>
    %cst_14 = arith.constant dense<0.000000e+00> : vector<16x128xf32>
    %17 = tpu.matmul %1, %16, %cst_14 {dimension_numbers = #tpu.dot_dimension_numbers<[1], [0], [0], [1], [0, 0, 1, 1], [], []>} : vector<16x128xf32>, vector<128x128xf32>, vector<16x128xf32> -> vector<16x128xf32>
    %18 = arith.addf %14, %17 : vector<16x128xf32>
    %c0_15 = arith.constant 0 : index
    %c0_16 = arith.constant 0 : index
    %19 = vector.load %arg4[%c0_15, %c0_16] : memref<1x128xf32, #tpu.memory_space<vmem>>, vector<1x128xf32>
    %20 = vector.broadcast %19 : vector<1x128xf32> to vector<16x128xf32>
    %21 = arith.addf %18, %20 : vector<16x128xf32>
    %cst_17 = arith.constant 0.000000e+00 : f32
    %22 = vector.broadcast %cst_17 : f32 to vector<16x128xf32>
    %23 = arith.maximumf %21, %22 : vector<16x128xf32>
    %c8_18 = arith.constant 8 : index
    %c0_19 = arith.constant 0 : index
    %24 = vector.load %arg11[%c8_18, %c0_19] : memref<24x128xf32, #tpu.memory_space<vmem>>, vector<16x128xf32>
    tpu.vector_store %arg11[%c8_18, %c0_19], %23 {strides = array<i32>} : memref<24x128xf32, #tpu.memory_space<vmem>>, vector<16x128xf32>,
    %c4_20 = arith.constant 4 : index
    %c0_21 = arith.constant 0 : index
    %25 = vector.load %arg11[%c4_20, %c0_21] : memref<24x128xf32, #tpu.memory_space<vmem>>, vector<16x128xf32>
    %c0_22 = arith.constant 0 : index
    %c0_23 = arith.constant 0 : index
    %c0_24 = arith.constant 0 : index
    %26 = vector.load %arg5[%c0_22, %c0_23, %c0_24] : memref<3x128x128xf32, #tpu.memory_space<vmem>>, vector<1x128x128xf32>
    %27 = vector.shape_cast %26 : vector<1x128x128xf32> to vector<128x128xf32>
    %cst_25 = arith.constant dense<0.000000e+00> : vector<16x128xf32>
    %28 = tpu.matmul %25, %27, %cst_25 {dimension_numbers = #tpu.dot_dimension_numbers<[1], [0], [0], [1], [0, 0, 1, 1], [], []>} : vector<16x128xf32>, vector<128x128xf32>, vector<16x128xf32> -> vector<16x128xf32>
    %c6_26 = arith.constant 6 : index
    %c0_27 = arith.constant 0 : index
    %29 = vector.load %arg11[%c6_26, %c0_27] : memref<24x128xf32, #tpu.memory_space<vmem>>, vector<16x128xf32>
    %c1_28 = arith.constant 1 : index
    %c0_29 = arith.constant 0 : index
    %c0_30 = arith.constant 0 : index
    %30 = vector.load %arg5[%c1_28, %c0_29, %c0_30] : memref<3x128x128xf32, #tpu.memory_space<vmem>>, vector<1x128x128xf32>
    %31 = vector.shape_cast %30 : vector<1x128x128xf32> to vector<128x128xf32>
    %cst_31 = arith.constant dense<0.000000e+00> : vector<16x128xf32>
    %32 = tpu.matmul %29, %31, %cst_31 {dimension_numbers = #tpu.dot_dimension_numbers<[1], [0], [0], [1], [0, 0, 1, 1], [], []>} : vector<16x128xf32>, vector<128x128xf32>, vector<16x128xf32> -> vector<16x128xf32>
    %33 = arith.addf %28, %32 : vector<16x128xf32>
    %c2_32 = arith.constant 2 : index
    %c0_33 = arith.constant 0 : index
    %c0_34 = arith.constant 0 : index
    %34 = vector.load %arg5[%c2_32, %c0_33, %c0_34] : memref<3x128x128xf32, #tpu.memory_space<vmem>>, vector<1x128x128xf32>
    %35 = vector.shape_cast %34 : vector<1x128x128xf32> to vector<128x128xf32>
    %cst_35 = arith.constant dense<0.000000e+00> : vector<16x128xf32>
    %36 = tpu.matmul %23, %35, %cst_35 {dimension_numbers = #tpu.dot_dimension_numbers<[1], [0], [0], [1], [0, 0, 1, 1], [], []>} : vector<16x128xf32>, vector<128x128xf32>, vector<16x128xf32> -> vector<16x128xf32>
    %37 = arith.addf %33, %36 : vector<16x128xf32>
    %c0_36 = arith.constant 0 : index
    %c0_37 = arith.constant 0 : index
    %38 = vector.load %arg6[%c0_36, %c0_37] : memref<1x128xf32, #tpu.memory_space<vmem>>, vector<1x128xf32>
    %39 = vector.broadcast %38 : vector<1x128xf32> to vector<16x128xf32>
    %40 = arith.addf %37, %39 : vector<16x128xf32>
    %cst_38 = arith.constant 0.000000e+00 : f32
    %41 = vector.broadcast %cst_38 : f32 to vector<16x128xf32>
    %42 = arith.maximumf %40, %41 : vector<16x128xf32>
    %c0_39 = arith.constant 0 : index
    %c0_40 = arith.constant 0 : index
    %43 = vector.load %arg7[%c0_39, %c0_40] : memref<128x128xf32, #tpu.memory_space<vmem>>, vector<128x128xf32>
    %cst_41 = arith.constant dense<0.000000e+00> : vector<16x128xf32>
    %44 = tpu.matmul %1, %43, %cst_41 {dimension_numbers = #tpu.dot_dimension_numbers<[1], [0], [0], [1], [0, 0, 1, 1], [], []>} : vector<16x128xf32>, vector<128x128xf32>, vector<16x128xf32> -> vector<16x128xf32>
    %c0_42 = arith.constant 0 : index
    %c0_43 = arith.constant 0 : index
    %45 = vector.load %arg8[%c0_42, %c0_43] : memref<1x128xf32, #tpu.memory_space<vmem>>, vector<1x128xf32>
    %46 = vector.broadcast %45 : vector<1x128xf32> to vector<16x128xf32>
    %47 = arith.addf %44, %46 : vector<16x128xf32>
    %48 = arith.addf %42, %47 : vector<16x128xf32>
    %cst_44 = arith.constant 0.000000e+00 : f32
    %49 = vector.broadcast %cst_44 : f32 to vector<16x128xf32>
    %50 = arith.maximumf %48, %49 : vector<16x128xf32>
    %c0_45 = arith.constant 0 : index
    %c0_46 = arith.constant 0 : index
    %c0_47 = arith.constant 0 : index
    %51 = vector.load %arg9[%c0_45, %c0_46, %c0_47] : memref<1x16x128xf32, #tpu.memory_space<vmem>>, vector<1x16x128xf32>
    %52 = vector.shape_cast %51 : vector<1x16x128xf32> to vector<16x128xf32>
    %53 = vector.shape_cast %50 : vector<16x128xf32> to vector<1x16x128xf32>
    tpu.vector_store %arg9[%c0_45, %c0_46, %c0_47], %53 {strides = array<i32>} : memref<1x16x128xf32, #tpu.memory_space<vmem>>, vector<1x16x128xf32>,
    %c0_i32_48 = arith.constant 0 : i32
    %54 = arith.cmpi slt, %arg1, %c0_i32_48 : i32
    %55 = arith.extui %54 : i1 to i32
    %c0_i32_49 = arith.constant 0 : i32
    %56 = arith.cmpi ne, %55, %c0_i32_49 : i32
    scf.if %56 {
      %c20 = arith.constant 20 : index
      %c0_50 = arith.constant 0 : index
      %57 = vector.load %arg10[%c20, %c0_50] : memref<24x128xf32, #tpu.memory_space<vmem>>, vector<4x128xf32>
      %c4_51 = arith.constant 4 : index
      %c0_52 = arith.constant 0 : index
      %58 = vector.load %arg10[%c4_51, %c0_52] : memref<24x128xf32, #tpu.memory_space<vmem>>, vector<4x128xf32>
      tpu.vector_store %arg10[%c4_51, %c0_52], %57 {strides = array<i32>} : memref<24x128xf32, #tpu.memory_space<vmem>>, vector<4x128xf32>,
      %c20_53 = arith.constant 20 : index
      %c0_54 = arith.constant 0 : index
      %59 = vector.load %arg11[%c20_53, %c0_54] : memref<24x128xf32, #tpu.memory_space<vmem>>, vector<4x128xf32>
      %c4_55 = arith.constant 4 : index
      %c0_56 = arith.constant 0 : index
      %60 = vector.load %arg11[%c4_55, %c0_56] : memref<24x128xf32, #tpu.memory_space<vmem>>, vector<4x128xf32>
      tpu.vector_store %arg11[%c4_55, %c0_56], %59 {strides = array<i32>} : memref<24x128xf32, #tpu.memory_space<vmem>>, vector<4x128xf32>,
    } else {
    }
    return
  }
  func.func @transform_0(%arg0: i32, %arg1: i32) -> (i32, i32, i32) {
    %c0_i32 = arith.constant 0 : i32
    %c0_i32_0 = arith.constant 0 : i32
    return %arg0, %arg1, %c0_i32 : i32, i32, i32
  }
  func.func @transform_1(%arg0: i32, %arg1: i32) -> (i32, i32, i32) {
    %c0_i32 = arith.constant 0 : i32
    %c0_i32_0 = arith.constant 0 : i32
    %c0_i32_1 = arith.constant 0 : i32
    %c0_i32_2 = arith.constant 0 : i32
    return %c0_i32, %c0_i32_0, %c0_i32_1 : i32, i32, i32
  }
  func.func @transform_2(%arg0: i32, %arg1: i32) -> (i32, i32) {
    %c0_i32 = arith.constant 0 : i32
    %c0_i32_0 = arith.constant 0 : i32
    %c0_i32_1 = arith.constant 0 : i32
    return %c0_i32, %c0_i32_0 : i32, i32
  }
  func.func @transform_3(%arg0: i32, %arg1: i32) -> (i32, i32, i32) {
    %c0_i32 = arith.constant 0 : i32
    %c0_i32_0 = arith.constant 0 : i32
    %c0_i32_1 = arith.constant 0 : i32
    %c0_i32_2 = arith.constant 0 : i32
    return %c0_i32, %c0_i32_0, %c0_i32_1 : i32, i32, i32
  }
  func.func @transform_4(%arg0: i32, %arg1: i32) -> (i32, i32) {
    %c0_i32 = arith.constant 0 : i32
    %c0_i32_0 = arith.constant 0 : i32
    %c0_i32_1 = arith.constant 0 : i32
    return %c0_i32, %c0_i32_0 : i32, i32
  }
  func.func @transform_5(%arg0: i32, %arg1: i32) -> (i32, i32) {
    %c0_i32 = arith.constant 0 : i32
    %c0_i32_0 = arith.constant 0 : i32
    %c0_i32_1 = arith.constant 0 : i32
    return %c0_i32, %c0_i32_0 : i32, i32
  }
  func.func @transform_6(%arg0: i32, %arg1: i32) -> (i32, i32) {
    %c0_i32 = arith.constant 0 : i32
    %c0_i32_0 = arith.constant 0 : i32
    %c0_i32_1 = arith.constant 0 : i32
    return %c0_i32, %c0_i32_0 : i32, i32
  }
  func.func @transform_7(%arg0: i32, %arg1: i32) -> (i32, i32, i32) {
    %c0_i32 = arith.constant 0 : i32
    %c0_i32_0 = arith.constant 0 : i32
    return %arg0, %arg1, %c0_i32 : i32, i32, i32
  }
}

</mosaic_0001>

<bundles_post_ra>
// kernel: tpu_custom_call.1
= control target key start
LH: loop header
LB: loop body
LE: loop exit
PB: predicated region body
PF: predicated region fallthrough
CT: control target
= control target key end

     0   :  { %s1458_s0 = inlined_call_operand.hbm [shape: f32[2,16,128], index: 0, kind: input, shape index: {}]   ;;  %s1459_s1 = inlined_call_operand.hbm [shape: f32[3,128,128], index: 1, kind: input, shape index: {}]   ;;  %s1460_s2 = inlined_call_operand.vmem [shape: f32[1,128], index: 2, kind: input, shape index: {}]   ;;  %s1461_s3 = inlined_call_operand.hbm [shape: f32[3,128,128], index: 3, kind: input, shape index: {}]   ;;  %s1462_s4 = inlined_call_operand.vmem [shape: f32[1,128], index: 4, kind: input, shape index: {}]   ;;  %s1463_s5 = inlined_call_operand.hbm [shape: f32[128,128], index: 5, kind: input, shape index: {}]   ;;  %s1464_s6 = inlined_call_operand.vmem [shape: f32[1,128], index: 6, kind: input, shape index: {}]   ;;  %s1465_s7 = inlined_call_operand.hbm [shape: f32[2,16,128], index: 7, kind: output, shape index: {}]  }
   0x1   :  { %1471 = sst [smem:[#allocation19_spill]] %s1459_s1 }
   0x2   :  { %1472 = sst [smem:[#allocation20_spill]] %s1461_s3 }
   0x3   :  { %1473 = sst [smem:[#allocation21_spill]] %s1463_s5 }
   0x4   :  { %12 = vsyncpa [#allocation5], 0 }
   0x5   :  { %14 = vsyncpa [#allocation5 + $0x1], 0 }
   0x6   :  { %15 = vsyncpa [#allocation8], 0 }
   0x7   :  { %16 = vsyncpa [#allocation11], 0 }
   0x8   :  { %17 = vsyncpa [#allocation6], 0 }
   0x9   :  { %19 = vsyncpa [#allocation6 + $0x1], 0  ;;  %s1238_s24 = smov 0   ;;  %s1240_s25 = smov 0  }
   0xa   :  { %s1242_s26 = smov 0   ;;  %s1244_s27 = smov 0  }
   0xb   :  { %s1246_s28 = smov 0   ;;  %s1248_s29 = smov 0  }
   0xc LB: > { %1474 = sst [smem:[#allocation17_spill]] %s1188_s29  ;;  %s838_s30 = sadd.s32 4294967295, %s1188_s29   ;;  %s1188_s29 = sphi %s1248_s29, %s25_s29   ;;  %s1184_s28 = sphi %s1246_s28, %s1495_s28   ;;  %s1180_s27 = sphi %s1244_s27, %s1494_s27   ;;  %s1176_s26 = sphi %s1242_s26, %s1493_s26   ;;  %s1172_s25 = sphi %s1240_s25, %s1492_s25   ;;  %s1168_s24 = sphi %s1238_s24, %s1491_s24  }
   0xd   : > { %s839_s8 = sadd.s32 4294967294, %s1188_s29   ;;  %p59_p0 = scmp.ne.s32.totalorder %s1172_s25, %s1168_s24 }
   0xe   : > { %p1272_p1 = scmp.eq.s32.totalorder %s838_s30, 0  ;;  %p1276_p2 = scmp.eq.s32.totalorder %s838_s30, 1 }
   0xf   : > { %p217_p3 = scmp.eq.s32.totalorder %s839_s8, 1  ;;  %p840_p5 = scmp.ge.s32.totalorder %s1188_s29, 1 }
  0x10   : > { %p1282_p4 = por %p1272_p1, %p59_p0  ;;  %p224_p7 = scmp.lt.s32.totalorder %s1188_s29, 3 }
  0x11   : > { %p1287_p6 = por %p217_p3, %p59_p0  ;;  %s1479_s1 = sld [smem:[#allocation19_spill]] }
  0x12   : > { %p1295_p8 = pnand %p840_p5, %p224_p7  ;;  %s1190_s17 = smov [#allocation7]  }
  0x13   : > { %s237_s18 = sshll.u32 %s1190_s17, 4  ;;  %p844_p11 = scmp.ge.s32.totalorder %s1188_s29, 2  ;;  %s238_s18 = int_to_ptr.vmem [resolvable:$true] %s237_s18 }
  0x14   : > { %p893_p9 = pneg %p1295_p8  ;;  %s1482_s3 = sld [smem:[#allocation20_spill]] }
  0x15   : > { %s1466_s23 = smov 128   ;;  %s1467_s30 = smov 8  }
  0x16   : > { %p1303_p10 = pnand %p893_p9, %p1272_p1  ;;  %s1193_s8 = smov [#allocation9]  }
  0x17   : > { %s235_s15 = sshll.u32 %s1479_s1, 4  ;;  %s254_s13 = sshll.u32 %s1193_s8, 4  ;;  %s236_s15 = int_to_ptr.hbm [resolvable:$true] %s235_s15  ;;  %s255_s13 = int_to_ptr.vmem [resolvable:$true] %s254_s13 }
  0x18   : > { %896 = dma.hbm_to_vmem [thread:$0]  (!%p1303_p10), %s236_s15, 6144, %s238_s18, [#allocation8], %s1466_s23, %s1466_s23, %s1467_s30  }
  0x19   : > { %s1483_s5 = sld [smem:[#allocation21_spill]]  ;;  %s1194_s21 = smov [#allocation10]  }
  0x1a   : > { %s252_s22 = sshll.u32 %s1482_s3, 4  ;;  %s271_s1 = sshll.u32 %s1194_s21, 4  ;;  %s253_s22 = int_to_ptr.hbm [resolvable:$true] %s252_s22  ;;  %s272_s1 = int_to_ptr.vmem [resolvable:$true] %s271_s1 }
  0x1b   : > { %899 = dma.hbm_to_vmem [thread:$0]  (!%p1303_p10), %s253_s22, 6144, %s255_s13, [#allocation8], %s1466_s23, %s1466_s23, %s1467_s30  }
  0x1c   : > { %s37_s15 = sadd.s32 1, %s1184_s28  ;;  %s46_s18 = sadd.s32 1, %s1176_s26 }
  0x1d   : > { %p39_p12 = scmp.ge.s32.totalorder %s37_s15, 2  ;;  %p53_p13 = scmp.ne.s32.totalorder %s1176_s26, %s1172_s25 }
  0x1e   : > { %p54_p0 = scmp.eq.s32.totalorder %s1188_s29, 0  ;;  %p914_p7 = scmp.lt.s32.totalorder %s1188_s29, 2 }
  0x1f   : > { %s269_s20 = sshll.u32 %s1483_s5, 4  ;;  %s1497_s15 = smov (%p39_p12, %s37_s15), 0  ;;  %s270_s20 = int_to_ptr.hbm [resolvable:$true] %s269_s20 }
  0x20   : > { %902 = dma.hbm_to_vmem [thread:$0]  (!%p1303_p10), %s270_s20, 2048, %s272_s1, [#allocation11], %s1466_s23, %s1466_s23, %s1467_s30  }
  0x21   : > { %1484 = sst [smem:[#allocation18_spill]] %s1497_s15  ;;  %p1336_p3 = por %p54_p0, %p53_p13 }
  0x22   : > { %p1342_p5 = por %p1276_p2, %p53_p13  ;;  %s41_s8 = ssub.s32 %s1184_s28, %s1497_s15 }
  0x23   : > { %p44_p9 = scmp.eq.s32.totalorder %s41_s8, 0  ;;  %s288_s1 = sand.u32 1, %s1176_s26  }
  0x24   : > { %s845_s13 = sshll.u32 %s288_s1, 4  ;;  %s859_s17 = sshll.u32 %s1184_s28, 4 }
  0x25   : > { %s1351_s14 = scalar_select %p44_p9, %s1176_s26, %s46_s18  }
  0x26   : > { %s299_s23 = scalar_lea.hbm %s1458_s0, %s859_s17  ;;  %s292_s30 = scalar_lea.vmem [#allocation4], %s845_s13 }
  0x27   : > { %s302_s3 = sshll.u32 %s292_s30, 4  ;;  %s300_s10 = sshll.u32 %s299_s23, 4  ;;  %s303_s3 = int_to_ptr.vmem [resolvable:$true] %s302_s3  ;;  %s301_s10 = int_to_ptr.hbm [resolvable:$true] %s300_s10 }
  0x28   : > { %p904_p2 = pnand %p914_p7, %p1336_p3  ;;  %s289_s5 = scalar_lea.sflag [#allocation5], %s288_s1 }
  0x29   : > { %s1487_s15 = smov 8   ;;  %s1488_s29 = smov 128  }
  0x2a   : > { %906 = dma.hbm_to_vmem [thread:$0]  (!%p904_p2), %s301_s10, 256, %s303_s3, %s289_s5, %s1488_s29, %s1488_s29, %s1487_s15  }
  0x2b   : > { %314 = sbr.rel (%p1295_p8) target bundleno = 395 (0x18b), region = 48  ;;  %s1365_s18 = sand.u32 (!%p1295_p8), 1, %s1172_s25  }
  0x2c   : > { %s849_s23 = sshll.u32 (!%p1295_p8), %s1365_s18, 4  ;;  %s317_s30 = scalar_lea.sflag (!%p1295_p8), [#allocation5], %s1365_s18 }
  0x2d   : > { %s1371_s22 = scalar_lea.vmem (!%p1295_p8), [#allocation4], %s849_s23 }
  0x30   : > { %1151 = dma.done.wait (%p1282_p4), %s317_s30, 256  }
  0x31   : > { %1153 = vsyncadd (%p1282_p4), %s317_s30, 4294967040 }
  0x32   : > { %1155 = dma.done.wait (%p1272_p1), [#allocation8], 12288  }
  0x33   : > { %1157 = vsyncadd (%p1272_p1), [#allocation8], 4294955008 }
  0x34   : > { %1159 = dma.done.wait (%p1272_p1), [#allocation11], 2048  }
  0x35   : > { %1161 = vsyncadd (%p1272_p1), [#allocation11], 4294965248  ;;  %v1195_v0 = vmov 0.0   ;;  %v478_v1 = vld [vmem:[#allocation7 + $0x178] sm:$0xff]  ;;  %v477_v2 = vld [vmem:[#allocation7 + $0x170] sm:$0xff]  ;;  %s366_s15 = scalar_lea.vmem [#allocation12], %s849_s23 }
  0x36   : > { %375 = vst [vmem:[#allocation2] sm:$0xff] %v1195_v0  ;;  %v415_v3 = vld [vmem:[#allocation7 + $0xf8] sm:$0xff]  ;;  %479 = vmatpush.msra.mxu2 %v478_v1  ;;  %v414_v5 = vld [vmem:[#allocation7 + $0xf0] sm:$0xff]  ;;  %v476_v6 = vld [vmem:[#allocation7 + $0x168] sm:$0xff]  ;;  %s860_s8 = sshll.u32 %s1180_s27, 4  ;;  %s719_s20 = sshll.u32 %s366_s15, 4  ;;  %s720_s20 = int_to_ptr.vmem [resolvable:$true] %s719_s20 }
  0x37   : > { %376 = vst [vmem:[#allocation3] sm:$0xff] %v1195_v0  ;;  %416 = vmatpush.msra.mxu0 %v415_v3  ;;  %v396_v4 = vld [vmem:[#allocation7 + $0x78] sm:$0xff]  ;;  %v395_v7 = vld [vmem:[#allocation7 + $0x70] sm:$0xff]  ;;  %v413_v8 = vld [vmem:[#allocation7 + $0xe8] sm:$0xff]  ;;  %s718_s17 = scalar_lea.hbm %s1465_s7, %s860_s8  ;;  %s705_s10 = scalar_lea.sflag [#allocation6], %s1365_s18 }
  0x38   : > { %439 = vmatpush.msra.mxu1 %v396_v4  ;;  %480 = vmatpush.msra.mxu2 %v477_v2  ;;  %v394_v9 = vld [vmem:[#allocation7 + $0x68] sm:$0xff]  ;;  %v475_v10 = vld [vmem:[#allocation7 + $0x160] sm:$0xff]  ;;  %v474_v13 = vld [vmem:[#allocation7 + $0x158] sm:$0xff]  ;;  %s721_s21 = sshll.u32 %s718_s17, 4  ;;  %s1118_s3 = scalar_lea.hbm %s1465_s7, 32  ;;  %s722_s21 = int_to_ptr.hbm [resolvable:$true] %s721_s21 }
  0x39   : > { %417 = vmatpush.msra.mxu0 %v414_v5  ;;  %v412_v11 = vld [vmem:[#allocation7 + $0xe0] sm:$0xff]  ;;  %v411_v14 = vld [vmem:[#allocation7 + $0xd8] sm:$0xff]  ;;  %v473_v16 = vld [vmem:[#allocation7 + $0x150] sm:$0xff]  ;;  %s1112_s27 = sshra.s32 %s722_s21, 4  ;;  %s1113_s27 = int_to_ptr.hbm [resolvable:$true] %s1112_s27 }
  0x3a   : > { %440 = vmatpush.msra.mxu1 %v395_v7  ;;  %481 = vmatpush.msra.mxu2 %v476_v6  ;;  %v393_v12 = vld [vmem:[#allocation7 + $0x60] sm:$0xff]  ;;  %v392_v15 = vld [vmem:[#allocation7 + $0x58] sm:$0xff]  ;;  %v410_v17 = vld [vmem:[#allocation7 + $0xd0] sm:$0xff]  ;;  %s1114_s23 = scalar_lea.hbm %s1113_s27, 16  ;;  %p1119_p10 = scmp.lt.s32.totalorder %s1113_s27, %s1465_s7 }
  0x3b   : > { %418 = vmatpush.msra.mxu0 %v413_v8  ;;  %v391_v18 = vld [vmem:[#allocation7 + $0x50] sm:$0xff]  ;;  %v472_v19 = vld [vmem:[#allocation7 + $0x148] sm:$0xff]  ;;  %v471_v22 = vld [vmem:[#allocation7 + $0x140] sm:$0xff]  ;;  %p1115_p1 = scmp.ne.s32.totalorder %s1113_s27, %s1114_s23  ;;  %p1120_p12 = scmp.lt.s32.totalorder %s1118_s3, %s1114_s23 }
  0x3c   : > { %441 = vmatpush.msra.mxu1 %v394_v9  ;;  %482 = vmatpush.msra.mxu2 %v475_v10  ;;  %v409_v20 = vld [vmem:[#allocation7 + $0xc8] sm:$0xff]  ;;  %v408_v23 = vld [vmem:[#allocation7 + $0xc0] sm:$0xff]  ;;  %v470_v25 = vld [vmem:[#allocation7 + $0x138] sm:$0xff] }
  0x3d   : > { %419 = vmatpush.msra.mxu0 %v412_v11  ;;  %v390_v21 = vld [vmem:[#allocation7 + $0x48] sm:$0xff]  ;;  %v389_v24 = vld [vmem:[#allocation7 + $0x40] sm:$0xff]  ;;  %v407_v26 = vld [vmem:[#allocation7 + $0xb8] sm:$0xff]  ;;  %p1116_p4 = pnand %p1115_p1, %p1342_p5  ;;  %p1121_p13 = por %p1120_p12, %p1119_p10 }
  0x3e   : > { %442 = vmatpush.msra.mxu1 %v393_v12  ;;  %483 = vmatpush.msra.mxu2 %v474_v13  ;;  %v1386_v27 = vld [vmem:[%s1371_s22] sm:$0xff]  ;;  %v388_v29 = vld [vmem:[#allocation7 + $0x38] sm:$0xff]  ;;  %v468_v35 = vld [vmem:[#allocation7 + $0x128] sm:$0xff] }
  0x3f   : > { %420 = vmatpush.msra.mxu0 %v411_v14  ;;  %v469_v28 = vld [vmem:[#allocation7 + $0x130] sm:$0xff]  ;;  %377 = vst [vmem:[#allocation2 + $0x8] sm:$0xff] %v1386_v27  ;;  %v1390_v31 = vld [vmem:[%s1371_s22 + $0x8] sm:$0xff]  ;;  %v467_v39 = vld [vmem:[#allocation7 + $0x120] sm:$0xff]  ;;  %p1117_p8 = pneg %p1116_p4 }
  0x40   : > { %443 = vmatpush.msra.mxu1 %v392_v15  ;;  %484 = vmatpush.msra.mxu2 %v473_v16  ;;  %v406_v30 = vld [vmem:[#allocation7 + $0xb0] sm:$0xff]  ;;  %v550_v32 = vld [vmem:[#allocation9 + $0xf8] sm:$0xff]  ;;  %378 = vst [vmem:[#allocation2 + $0x10] sm:$0xff] %v1390_v31  ;;  %v405_v36 = vld [vmem:[#allocation7 + $0xa8] sm:$0xff] }
  0x41   : > { %421 = vmatpush.msra.mxu0 %v410_v17  ;;  %v387_v33 = vld [vmem:[#allocation7 + $0x30] sm:$0xff]  ;;  %551 = vmatpush.msra.mxu3 %v550_v32  ;;  %v386_v37 = vld [vmem:[#allocation7 + $0x28] sm:$0xff]  ;;  %v404_v40 = vld [vmem:[#allocation7 + $0xa0] sm:$0xff]  ;;  %p1122_p0 = pnand %p1121_p13, %p1117_p8 }
  0x42   : > { %444 = vmatpush.msra.mxu1 %v391_v18  ;;  %485 = vmatpush.msra.mxu2 %v472_v19  ;;  %v549_v34 = vld [vmem:[#allocation9 + $0xf0] sm:$0xff]  ;;  %v548_v38 = vld [vmem:[#allocation9 + $0xe8] sm:$0xff]  ;;  %v385_v41 = vld [vmem:[#allocation7 + $0x20] sm:$0xff] }
  0x43   : > { %422 = vmatpush.msra.mxu0 %v409_v20  ;;  %552 = vmatpush.msra.mxu3 %v549_v34  ;;  %v547_v42 = vld [vmem:[#allocation9 + $0xe0] sm:$0xff]  ;;  %v466_v43 = vld [vmem:[#allocation7 + $0x118] sm:$0xff]  ;;  %v465_v47 = vld [vmem:[#allocation7 + $0x110] sm:$0xff] }
  0x44   : > { %445 = vmatpush.msra.mxu1 %v390_v21  ;;  %486 = vmatpush.msra.mxu2 %v471_v22  ;;  %v403_v44 = vld [vmem:[#allocation7 + $0x98] sm:$0xff]  ;;  %v402_v48 = vld [vmem:[#allocation7 + $0x90] sm:$0xff]  ;;  %v464_v51 = vld [vmem:[#allocation7 + $0x108] sm:$0xff] }
  0x45   : > { %423 = vmatpush.msra.mxu0 %v408_v23  ;;  %553 = vmatpush.msra.mxu3 %v548_v38  ;;  %v384_v45 = vld [vmem:[#allocation7 + $0x18] sm:$0xff]  ;;  %v383_v49 = vld [vmem:[#allocation7 + $0x10] sm:$0xff]  ;;  %v401_v52 = vld [vmem:[#allocation7 + $0x88] sm:$0xff] }
  0x46   : > { %446 = vmatpush.msra.mxu1 %v389_v24  ;;  %487 = vmatpush.msra.mxu2 %v470_v25  ;;  %v546_v46 = vld [vmem:[#allocation9 + $0xd8] sm:$0xff]  ;;  %v545_v50 = vld [vmem:[#allocation9 + $0xd0] sm:$0xff]  ;;  %v382_v53 = vld [vmem:[#allocation7 + $0x8] sm:$0xff] }
  0x47   : > { %424 = vmatpush.msra.mxu0 %v407_v26  ;;  %554 = vmatpush.msra.mxu3 %v547_v42  ;;  %v544_v54 = vld [vmem:[#allocation9 + $0xc8] sm:$0xff]  ;;  %v463_v55 = vld [vmem:[#allocation7 + $0x100] sm:$0xff]  ;;  %v397_v58 = vld [vmem:[#allocation2 + $0x6] sm:$0xff] }
  0x48   : > { %447 = vmatpush.msra.mxu1 %v388_v29  ;;  %488 = vmatpush.msra.mxu2 %v469_v28  ;;  %v400_v56 = vld [vmem:[#allocation7 + $0x80] sm:$0xff]  ;;  %v379_v59 = vld [vmem:[#allocation2 + $0x4] sm:$0xff]  ;;  %v611_v4 = vld [vmem:[#allocation9 + $0x168] sm:$0xff] }
  0x49   : > { %425 = vmatpush.msra.mxu0 %v406_v30  ;;  %555 = vmatpush.msra.mxu3 %v546_v46  ;;  %v381_v57 = vld [vmem:[#allocation7] sm:$0xff]  ;;  %v613_v60 = vld [vmem:[#allocation9 + $0x178] sm:$0xff]  ;;  %v612_v0 = vld [vmem:[#allocation9 + $0x170] sm:$0xff] }
  0x4a   : > { %448 = vmatpush.msra.mxu1 %v387_v33  ;;  %489 = vmatpush.msra.mxu2 %v468_v35  ;;  %v543_v61 = vld [vmem:[#allocation9 + $0xc0] sm:$0xff]  ;;  %v1394_v62 = vld [vmem:[#allocation9 + $0x78] sm:$0xff]  ;;  %v1396_v2 = vld [vmem:[#allocation9 + $0x70] sm:$0xff] }
  0x4b   : > { %426 = vmatpush.msra.mxu0 %v405_v36  ;;  %556 = vmatpush.msra.mxu3 %v545_v50  ;;  %v662_v63 = vld [vmem:[#allocation10 + $0x78] sm:$0xff]  ;;  %v661_v3 = vld [vmem:[#allocation10 + $0x70] sm:$0xff]  ;;  %v1399_v6 = vld [vmem:[#allocation9 + $0x68] sm:$0xff] }
  0x4c   : > { %449 = vmatpush.msra.mxu1 %v386_v37  ;;  %490 = vmatpush.msra.mxu2 %v467_v39  ;;  %v542_v1 = vld [vmem:[#allocation9 + $0xb8] sm:$0xff]  ;;  %v541_v5 = vld [vmem:[#allocation9 + $0xb0] sm:$0xff]  ;;  %v660_v7 = vld [vmem:[#allocation10 + $0x68] sm:$0xff] }
  0x4d   : > { %427 = vmatpush.msra.mxu0 %v404_v40  ;;  %557 = vmatpush.msra.mxu3 %v544_v54  ;;  %v610_v8 = vld [vmem:[#allocation9 + $0x160] sm:$0xff]  ;;  %v609_v11 = vld [vmem:[#allocation9 + $0x158] sm:$0xff]  ;;  %v540_v12 = vld [vmem:[#allocation9 + $0xa8] sm:$0xff] }
  0x4e   : > { %450 = vmatpush.msra.mxu1 %v385_v41  ;;  %491 = vmatpush.msra.mxu2 %v466_v43  ;;  %v398_v9 = vld [vmem:[#allocation2 + $0xe] sm:$0xff]  ;;  %v608_v15 = vld [vmem:[#allocation9 + $0x150] sm:$0xff]  ;;  %v607_v18 = vld [vmem:[#allocation9 + $0x148] sm:$0xff] }
  0x4f   : > { %428 = vmatpush.msra.mxu0 %v403_v44  ;;  %558 = vmatpush.msra.mxu3 %v543_v61  ;;  %v380_v10 = vld [vmem:[#allocation2 + $0xc] sm:$0xff]  ;;  %v526_v20 = vld [vmem:[#allocation9 + $0x50] sm:$0xff]  ;;  %v525_v23 = vld [vmem:[#allocation9 + $0x48] sm:$0xff] }
  0x50   : > { %451 = vmatpush.msra.mxu1 %v384_v45  ;;  %492 = vmatpush.msra.mxu2 %v465_v47  ;;  %v528_v13 = vld [vmem:[#allocation9 + $0x60] sm:$0xff]  ;;  %v527_v17 = vld [vmem:[#allocation9 + $0x58] sm:$0xff]  ;;  %v537_v22 = vld [vmem:[#allocation9 + $0x90] sm:$0xff] }
  0x51   : > { %429 = vmatpush.msra.mxu0 %v402_v48  ;;  %559 = vmatpush.msra.mxu3 %v542_v1  ;;  %v659_v14 = vld [vmem:[#allocation10 + $0x60] sm:$0xff]  ;;  %v538_v19 = vld [vmem:[#allocation9 + $0x98] sm:$0xff]  ;;  %v536_v25 = vld [vmem:[#allocation9 + $0x88] sm:$0xff] }
  0x52   : > { %452 = vmatpush.msra.mxu1 %v383_v49  ;;  %493 = vmatpush.msra.mxu2 %v464_v51  ;;  %v539_v16 = vld [vmem:[#allocation9 + $0xa0] sm:$0xff]  ;;  %v605_v24 = vld [vmem:[#allocation9 + $0x138] sm:$0xff]  ;;  %v604_v26 = vld [vmem:[#allocation9 + $0x130] sm:$0xff] }
  0x53   : > { %430 = vmatpush.msra.mxu0 %v401_v52  ;;  %560 = vmatpush.msra.mxu3 %v541_v5  ;;  %v606_v21 = vld [vmem:[#allocation9 + $0x140] sm:$0xff]  ;;  %v603_v28 = vld [vmem:[#allocation9 + $0x128] sm:$0xff]  ;;  %v658_v32 = vld [vmem:[#allocation10 + $0x58] sm:$0xff] }
  0x54   : > { %453 = vmatpush.msra.mxu1 %v382_v53  ;;  %494 = vmatpush.msra.mxu2 %v463_v55  ;;  %v524_v29 = vld [vmem:[#allocation9 + $0x40] sm:$0xff]  ;;  %v523_v34 = vld [vmem:[#allocation9 + $0x38] sm:$0xff]  ;;  %v657_v36 = vld [vmem:[#allocation10 + $0x50] sm:$0xff] }
  0x55   : > { %431 = vmatpush.msra.mxu0 %v400_v56  ;;  %495 = vmatmul.f32.vlgmr.msra.gmra.mxu2 %v1386_v27  ;;  %v602_v30 = vld [vmem:[#allocation9 + $0x120] sm:$0xff]  ;;  %v601_v35 = vld [vmem:[#allocation9 + $0x118] sm:$0xff]  ;;  %v522_v37 = vld [vmem:[#allocation9 + $0x30] sm:$0xff] }
  0x56   : > { %454 = vmatpush.msra.mxu1 %v381_v57  ;;  %432 = vmatmul.f32.vlgmr.msra.gmra.mxu0 %v397_v58  ;;  %v535_v33 = vld [vmem:[#allocation9 + $0x80] sm:$0xff]  ;;  %v600_v38 = vld [vmem:[#allocation9 + $0x110] sm:$0xff]  ;;  %v656_v39 = vld [vmem:[#allocation10 + $0x48] sm:$0xff] }
  0x57   : > { %455 = vmatmul.f32.vlgmr.msra.gmra.mxu1 %v379_v59  ;;  %574 = vmatpush.msrb.mxu0 %v1394_v62  ;;  %v521_v40 = vld [vmem:[#allocation9 + $0x28] sm:$0xff]  ;;  %v655_v42 = vld [vmem:[#allocation10 + $0x40] sm:$0xff]  ;;  %v654_v45 = vld [vmem:[#allocation10 + $0x38] sm:$0xff] }
  0x58   : > { %614 = vmatpush.msrb.mxu1 %v613_v60  ;;  %667 = vmatpush.msrb.mxu2 %v662_v63  ;;  %v599_v41 = vld [vmem:[#allocation9 + $0x108] sm:$0xff]  ;;  %v520_v43 = vld [vmem:[#allocation9 + $0x20] sm:$0xff]  ;;  %v519_v46 = vld [vmem:[#allocation9 + $0x18] sm:$0xff] }
  0x59   : > { %575 = vmatpush.msrb.mxu0 %v1396_v2  ;;  %561 = vmatpush.msra.mxu3 %v540_v12  ;;  %v598_v44 = vld [vmem:[#allocation9 + $0x100] sm:$0xff]  ;;  %v653_v47 = vld [vmem:[#allocation10 + $0x30] sm:$0xff]  ;;  %v652_v49 = vld [vmem:[#allocation10 + $0x28] sm:$0xff] }
  0x5a   : > { %615 = vmatpush.msrb.mxu1 %v612_v0  ;;  %668 = vmatpush.msrb.mxu2 %v661_v3  ;;  %v518_v48 = vld [vmem:[#allocation9 + $0x10] sm:$0xff]  ;;  %v517_v50 = vld [vmem:[#allocation9 + $0x8] sm:$0xff]  ;;  %v651_v51 = vld [vmem:[#allocation10 + $0x20] sm:$0xff] }
  0x5b   : > { %576 = vmatpush.msrb.mxu0 %v1399_v6  ;;  %562 = vmatpush.msra.mxu3 %v539_v16  ;;  %v516_v52 = vld [vmem:[#allocation9] sm:$0xff]  ;;  %v650_v53 = vld [vmem:[#allocation10 + $0x18] sm:$0xff]  ;;  %v649_v54 = vld [vmem:[#allocation10 + $0x10] sm:$0xff] }
  0x5c   : > { %616 = vmatpush.msrb.mxu1 %v611_v4  ;;  %669 = vmatpush.msrb.mxu2 %v660_v7  ;;  %v648_v55 = vld [vmem:[#allocation10 + $0x8] sm:$0xff]  ;;  %v647_v56 = vld [vmem:[#allocation10] sm:$0xff]  ;;  %v975_v60 = vld [vmem:[%s1460_s2] ss:$0 sm:$0xff] }
  0x5d   : > { %498 = vmatmul.f32.gmra.mxu2 %v1390_v31  ;;  %577 = vmatpush.msrb.mxu0 %v528_v13 }
  0x5e   : > { %617 = vmatpush.msrb.mxu1 %v610_v8  ;;  %435 = vmatmul.f32.gmra.mxu0 %v398_v9 }
  0x5f   : > { %458 = vmatmul.f32.gmra.mxu1 %v380_v10  ;;  %670 = vmatpush.msrb.mxu2 %v659_v14  ;;  %v977_v14 = vld [vmem:[%s1464_s6] ss:$0 sm:$0xff] }
  0x60   : > { %618 = vmatpush.msrb.mxu1 %v609_v11  ;;  %578 = vmatpush.msrb.mxu0 %v527_v17 }
  0x61   : > { %563 = vmatpush.msra.mxu3 %v538_v19  ;;  %671 = vmatpush.msrb.mxu2 %v658_v32 }
  0x62   : > { %619 = vmatpush.msrb.mxu1 %v608_v15  ;;  %579 = vmatpush.msrb.mxu0 %v526_v20 }
  0x63   : > { %564 = vmatpush.msra.mxu3 %v537_v22  ;;  %672 = vmatpush.msrb.mxu2 %v657_v36 }
  0x64   : > { %620 = vmatpush.msrb.mxu1 %v607_v18  ;;  %580 = vmatpush.msrb.mxu0 %v525_v23 }
  0x65   : > { %565 = vmatpush.msra.mxu3 %v536_v25  ;;  %673 = vmatpush.msrb.mxu2 %v656_v39 }
  0x66   : > { %621 = vmatpush.msrb.mxu1 %v606_v21  ;;  %581 = vmatpush.msrb.mxu0 %v524_v29 }
  0x67   : > { %566 = vmatpush.msra.mxu3 %v535_v33  ;;  %674 = vmatpush.msrb.mxu2 %v655_v42 }
  0x68   : > { %622 = vmatpush.msrb.mxu1 %v605_v24  ;;  %582 = vmatpush.msrb.mxu0 %v523_v34 }
  0x69   : > { %861 = vmatpush.msrb.mxu3 %v1394_v62  ;;  %675 = vmatpush.msrb.mxu2 %v654_v45 }
  0x6a   : > { %623 = vmatpush.msrb.mxu1 %v604_v26  ;;  %583 = vmatpush.msrb.mxu0 %v522_v37 }
  0x6b   : > { %862 = vmatpush.msrb.mxu3 %v1396_v2  ;;  %676 = vmatpush.msrb.mxu2 %v653_v47 }
  0x6c   : > { %624 = vmatpush.msrb.mxu1 %v603_v28  ;;  %584 = vmatpush.msrb.mxu0 %v521_v40 }
  0x6d   : > { %863 = vmatpush.msrb.mxu3 %v1399_v6  ;;  %677 = vmatpush.msrb.mxu2 %v652_v49 }
  0x6e   : > { %625 = vmatpush.msrb.mxu1 %v602_v30  ;;  %585 = vmatpush.msrb.mxu0 %v520_v43 }
  0x6f   : > { %864 = vmatpush.msrb.mxu3 %v528_v13  ;;  %678 = vmatpush.msrb.mxu2 %v651_v51  ;;  %v976_v13 = vld [vmem:[%s1462_s4] ss:$0 sm:$0xff] }
  0x70   : > { %626 = vmatpush.msrb.mxu1 %v601_v35  ;;  %586 = vmatpush.msrb.mxu0 %v519_v46 }
  0x71   : > { %865 = vmatpush.msrb.mxu3 %v527_v17  ;;  %679 = vmatpush.msrb.mxu2 %v650_v53 }
  0x72   : > { %627 = vmatpush.msrb.mxu1 %v600_v38  ;;  %587 = vmatpush.msrb.mxu0 %v518_v48 }
  0x73   : > { %866 = vmatpush.msrb.mxu3 %v526_v20  ;;  %680 = vmatpush.msrb.mxu2 %v649_v54 }
  0x74   : > { %628 = vmatpush.msrb.mxu1 %v599_v41  ;;  %588 = vmatpush.msrb.mxu0 %v517_v50 }
  0x75   : > { %867 = vmatpush.msrb.mxu3 %v525_v23  ;;  %681 = vmatpush.msrb.mxu2 %v648_v55 }
  0x76   : > { %629 = vmatpush.msrb.mxu1 %v598_v44  ;;  %589 = vmatpush.msrb.mxu0 %v516_v52 }
  0x77   : > { %868 = vmatpush.msrb.mxu3 %v524_v29  ;;  %682 = vmatpush.msrb.mxu2 %v647_v56 }
  0x78   : > { %683 = vmatmul.f32.vlgmr.msrb.gmra.mxu2 %v1386_v27 }
  0x79   : > { %869 = vmatpush.msrb.mxu3 %v523_v34 }
  0x7b   : > { %870 = vmatpush.msrb.mxu3 %v522_v37 }
  0x7d   : > { %871 = vmatpush.msrb.mxu3 %v521_v40 }
  0x7f   : > { %872 = vmatpush.msrb.mxu3 %v520_v43 }
  0x80   : > { %686 = vmatmul.f32.gmra.mxu2 %v1390_v31 }
  0x81   : > { %873 = vmatpush.msrb.mxu3 %v519_v46 }
  0x83   : > { %874 = vmatpush.msrb.mxu3 %v518_v48 }
  0x85   : > { %875 = vmatpush.msrb.mxu3 %v517_v50 }
  0x87   : > { %876 = vmatpush.msrb.mxu3 %v516_v52 }
  0xd3   : > { %v433_v57 = vpop.f32.mrf.mxu0 }
  0xd4   : > { %v456_v58 = vpop.f32.mrf.mxu1 }
  0xd5   : > { %v457_v59 = vadd.f32 %v456_v58, %v433_v57 }
  0xd8   : > { %v496_v61 = vpop.f32.mrf.mxu2 }
  0xd9   : > { %v502_v62 = vadd.f32 %v496_v61, %v457_v59 }
  0xdb   : > { %v508_v63 = vadd.f32 %v975_v60, %v502_v62  ;;  %v436_v0 = vpop.f32.mrf.mxu0 }
  0xdc   : > { %v459_v1 = vpop.f32.mrf.mxu1 }
  0xdd   : > { %v510_v2 = vmax.f32 %v508_v63, 0.0  ;;  %v460_v27 = vadd.f32 %v459_v1, %v436_v0 }
  0xdf   : > { %512 = vst [vmem:[#allocation3 + $0x8] sm:$0xff] %v510_v2  ;;  %630 = vmatmul.f32.vlgmr.msrb.gmra.mxu1 %v510_v2 }
  0xe0   : > { %v499_v3 = vpop.f32.mrf.mxu2 }
  0xe1   : > { %v503_v4 = vadd.f32 %v499_v3, %v460_v27 }
  0xe3   : > { %v509_v5 = vadd.f32 %v975_v60, %v503_v4 }
  0xe5   : > { %v511_v6 = vmax.f32 %v509_v5, 0.0 }
  0xe6   : > { %v532_v7 = vld [vmem:[#allocation3 + $0x6] sm:$0xff] }
  0xe7   : > { %v514_v8 = vld [vmem:[#allocation3 + $0x4] sm:$0xff]  ;;  %567 = vmatmul.f32.vlgmr.msra.gmra.mxu3 %v532_v7  ;;  %513 = vst [vmem:[#allocation3 + $0x10] sm:$0xff] %v511_v6  ;;  %633 = vmatmul.f32.gmra.mxu1 %v511_v6 }
  0xe8   : > { %590 = vmatmul.f32.vlgmr.msrb.gmra.mxu0 %v514_v8 }
  0xee   : > { %v533_v31 = vld [vmem:[#allocation3 + $0xe] sm:$0xff] }
  0xef   : > { %570 = vmatmul.f32.gmra.mxu3 %v533_v31  ;;  %v515_v9 = vld [vmem:[#allocation3 + $0xc] sm:$0xff] }
  0xf7   : > { %593 = vmatmul.f32.vlgmr.msrb.gmra.mxu3 %v515_v9 }
  0xfb   : > { %v684_v16 = vpop.f32.mrf.mxu2 }
  0xfc   : > { %v685_v19 = vadd.f32 %v977_v14, %v684_v16 }
 0x103   : > { %v687_v28 = vpop.f32.mrf.mxu2 }
 0x104   : > { %v688_v32 = vadd.f32 %v977_v14, %v687_v28 }
 0x15c   : > { %v631_v15 = vpop.f32.mrf.mxu1 }
 0x164   : > { %v634_v26 = vpop.f32.mrf.mxu1 }
 0x165   : > { %v591_v10 = vpop.f32.mrf.mxu0 }
 0x16a   : > { %v568_v11 = vpop.f32.mrf.mxu3 }
 0x16b   : > { %v592_v12 = vadd.f32 %v591_v10, %v568_v11 }
 0x16d   : > { %v637_v17 = vadd.f32 %v631_v15, %v592_v12 }
 0x16f   : > { %v643_v18 = vadd.f32 %v976_v13, %v637_v17 }
 0x171   : > { %v645_v20 = vmax.f32 %v643_v18, 0.0 }
 0x172   : > { %v571_v21 = vpop.f32.mrf.mxu3 }
 0x173   : > { %v690_v22 = vadd.f32 %v685_v19, %v645_v20 }
 0x175   : > { %v692_v23 = vmax.f32 %v690_v22, 0.0 }
 0x177   : > { %694 = vst [vmem:[%s366_s15] sm:$0xff] %v692_v23 }
 0x17a   : > { %v594_v24 = vpop.f32.mrf.mxu3 }
 0x17b   : > { %v595_v25 = vadd.f32 %v594_v24, %v571_v21 }
 0x17d   : > { %v638_v29 = vadd.f32 %v634_v26, %v595_v25 }
 0x17f   : > { %v644_v30 = vadd.f32 %v976_v13, %v638_v29 }
 0x181   : > { %v646_v33 = vmax.f32 %v644_v30, 0.0 }
 0x183   : > { %v691_v34 = vadd.f32 %v688_v32, %v646_v33 }
 0x185   : > { %v693_v35 = vmax.f32 %v691_v34, 0.0 }
 0x187   : > { %695 = vst [vmem:[%s366_s15 + $0x8] sm:$0xff] %v693_v35 }
 0x188   : > { %1125 = shalt.err (!%p1122_p0)
}
 0x189   : > { %s1196_s18 = smov 128   ;;  %s1197_s9 = smov 8  }
 0x18a   : > { %891 = dma.vmem_to_hbm [thread:$0]  (%p1342_p5), %s720_s20, 256, %s722_s21, %s705_s10, %s1196_s18, %s1196_s18, %s1197_s9  }
 0x18b PF: > { %s1489_s11 = sld [smem:[#allocation17_spill]]  ;;  %s736_s16 = sand.u32 1, %s1168_s24  }
 0x18c   : > { %p908_p3 = pnand %p844_p11, %p1287_p6  ;;  %s737_s15 = scalar_lea.sflag [#allocation6], %s736_s16 }
 0x18e   : > { %p909_p7 = pneg %p908_p3 }
 0x190   : > { %1163 = dma.done.wait (%p909_p7), %s737_s15, 256  }
 0x191   : > { %1165 = vsyncadd (%p909_p7), %s737_s15, 4294967040  ;;  %s25_s29 = sadd.s32 1, %s1489_s11   ;;  %s1490_s19 = sld [smem:[#allocation18_spill]] }
 0x192   : > { %p22_p9 = scmp.ge.s32.totalorder %s25_s29, 4   ;;  %s1491_s24 = smov %s1172_s25 }
 0x193   : > { %s1492_s25 = smov %s1176_s26  ;;  %s1493_s26 = smov %s1351_s14 }
 0x194   : > { %s1494_s27 = smov %s1184_s28  ;;  %24 = sbr.rel (!%p22_p9) target bundleno = 12 (0xc), region = 117 }
 0x197   : > { %s1495_s28 = smov %s1490_s19 }
 0x199   :  { %743 = vsyncpa [#allocation5], 1 }
 0x19a   :  { %745 = vsyncpa [#allocation5 + $0x1], 1 }
 0x19b   :  { %746 = vsyncpa [#allocation8], 1 }
 0x19c   :  { %747 = vsyncpa [#allocation11], 1 }
 0x19d   :  { %748 = vsyncpa [#allocation6], 1 }
 0x19e   :  { %750 = vsyncpa [#allocation6 + $0x1], 1 }

</bundles_post_ra>
